<compile_context>
chip_gen: v7x
topology: tpu7x:2x2x1
jax: 0.10.0
libtpu: 0.0.40
codegen_flags: <defaults>
</compile_context>

<pallas_src>
import functools

import jax
import jax.numpy as jnp
from jax.experimental import pallas as pl
from jax.experimental.pallas import tpu as pltpu


# ----------------------------- Pallas kernel -------------------------------

def _gemm_bias_relu_kernel(w_ref, a_ref, b_ref, o_ref, *, nk):
    """o[tn, tm] = relu( (W' @ A)[tn, tm] + bias[tn, 1] ).

    W' is the BN-scale-folded weight block (tn, tk) bf16, A is the im2col
    activation block (tk, tm) bf16; accumulation is f32 directly into the
    resident output block across the innermost ("arbitrary") K axis.
    `nk` (number of K grid steps) is a Python int, so the single-step case
    compiles to one store with no read-modify-write at all.
    """
    prod = jnp.dot(w_ref[...], a_ref[...], preferred_element_type=jnp.float32)

    if nk == 1:
        o_ref[...] = jnp.maximum(prod + b_ref[...], 0.0)
        return

    k = pl.program_id(2)

    @pl.when(k == 0)
    def _():
        o_ref[...] = prod                       # first step: plain store

    @pl.when(jnp.logical_and(k > 0, k < nk - 1))
    def _():
        o_ref[...] += prod                      # middle steps: accumulate

    @pl.when(k == nk - 1)
    def _():                                    # last step: fused epilogue
        o_ref[...] = jnp.maximum(o_ref[...] + prod + b_ref[...], 0.0)


# ------------------------------ tile choice ---------------------------------

def _round_up(x, m):
    return ((x + m - 1) // m) * m


def _choose_tiles(M, K, N, vmem_budget=12 << 20):
    """Pick (Mpad, tm), (Npad, tn), (Kpad, tk) and the VMEM estimate.

    Full-dim blocks need no alignment padding, so small dims are taken whole
    (zero padding inflation of the streamed activations).  Split dims use
    512/256 tiles (128-aligned lanes, 256-deep MXU contraction on v6e/v7x).
    The VMEM model counts 2x-buffered bf16 A & W tiles and the 2x-buffered
    f32 output tile, and must fit the tightest default scoped limit (v5e 16M,
    v7x 32M of 64M physical).
    """
    # M: lane dim of A^T and of the output.
    if M <= 1024:
        tm, Mpad = M, M
    else:
        tm = 512
        Mpad = _round_up(M, tm)

    # N: output channels (sublane dim of the output) -- whole unless huge;
    # never split on single-TC chips' behalf now that M carries parallelism.
    if N <= 512:
        tn, Npad = N, N
    else:
        tn = 256
        Npad = _round_up(N, tn)

    # K: reduction -- single grid step when it fits, else 512-chunks.
    if K <= 2048:
        tk, Kpad = K, K
    else:
        tk = 512
        Kpad = _round_up(K, tk)

    def vmem(tm_, tn_, tk_):
        return 2 * (tk_ * tm_ * 2      # double-buffered bf16 activations
                    + tn_ * tk_ * 2    # double-buffered bf16 weights
                    + tn_ * tm_ * 4    # double-buffered f32 output block
                    + tn_ * 4)         # bias

    if vmem(tm, tn, tk) > vmem_budget and tk > 512:
        tk = 512
        Kpad = _round_up(K, tk)
    if vmem(tm, tn, tk) > vmem_budget and tm > 512:
        tm = 512
        Mpad = _round_up(M, tm)

    return (Mpad, tm), (Npad, tn), (Kpad, tk), vmem(tm, tn, tk)


# ------------------------------ pallas_call ---------------------------------

def fused_gemm_bias_relu(w_t, a_t, bias):
    """relu(W'^T @ A^T + bias):  w_t [N,K] bf16, a_t [K,M] bf16, bias [N] f32.

    Returns [N, M] float32 (channel-major, lane-dense in M).
    """
    N, K = w_t.shape
    K2, M = a_t.shape
    assert K == K2, (K, K2)

    (Mpad, tm), (Npad, tn), (Kpad, tk), vmem_est = _choose_tiles(M, K, N)

    w_t = w_t.astype(jnp.bfloat16)
    a_t = a_t.astype(jnp.bfloat16)
    if (Kpad, Mpad) != (K, M):
        a_t = jnp.pad(a_t, ((0, Kpad - K), (0, Mpad - M)))
    if (Npad, Kpad) != (N, K):
        w_t = jnp.pad(w_t, ((0, Npad - N), (0, Kpad - K)))
    b2 = bias.reshape(N, 1).astype(jnp.float32)
    if Npad != N:
        b2 = jnp.pad(b2, ((0, Npad - N), (0, 0)))

    grid = (Mpad // tm, Npad // tn, Kpad // tk)
    nk = grid[2]

    cost = pl.CostEstimate(
        flops=2 * Npad * Kpad * Mpad,
        transcendentals=0,
        bytes_accessed=(Kpad * Mpad * 2 + Npad * Kpad * 2
                        + Npad * Mpad * 4 + Npad * 4),
    )

    out = pl.pallas_call(
        functools.partial(_gemm_bias_relu_kernel, nk=nk),
        out_shape=jax.ShapeDtypeStruct((Npad, Mpad), jnp.float32),
        grid_spec=pltpu.PrefetchScalarGridSpec(
            num_scalar_prefetch=0,
            grid=grid,                                   # (M, N, K) blocks
            in_specs=[
                pl.BlockSpec((tn, tk), lambda mi, nj, kk: (nj, kk)),  # W'
                pl.BlockSpec((tk, tm), lambda mi, nj, kk: (kk, mi)),  # A^T
                pl.BlockSpec((tn, 1), lambda mi, nj, kk: (nj, 0)),    # bias
            ],
            out_specs=pl.BlockSpec((tn, tm), lambda mi, nj, kk: (nj, mi)),
        ),
        compiler_params=pltpu.CompilerParams(
            dimension_semantics=("parallel", "parallel", "arbitrary"),
            vmem_limit_bytes=int(max(16 << 20, vmem_est + (4 << 20))),
        ),
        cost_estimate=cost,
    )(w_t, a_t, b2)

    if (Npad, Mpad) != (N, M):
        out = out[:N, :M]
    return out


# ------------------------------- JAX glue -----------------------------------

def im2col_T(x_nchw, kh, kw, stride, pad):
    """NCHW x -> A^T [kh*kw*C, n*ho*wo] (K ordered (dy, dx, c); M is last dim)."""
    n, c, h, w = x_nchw.shape
    ho = (h + 2 * pad - kh) // stride + 1
    wo = (w + 2 * pad - kw) // stride + 1
    xp = jnp.pad(x_nchw, ((0, 0), (0, 0), (pad, pad), (pad, pad)))
    taps = []
    for dy in range(kh):
        for dx in range(kw):
            t = xp[:, :, dy:dy + stride * ho:stride, dx:dx + stride * wo:stride]
            taps.append(jnp.transpose(t, (1, 0, 2, 3)).reshape(c, n * ho * wo))
    return jnp.concatenate(taps, axis=0), ho, wo


def basic_conv_forward(params, x_nchw, *, kernel_size, stride=1, padding=0):
    """BasicConv.forward (Conv2d no-bias + BatchNorm2d eval + ReLU), NCHW in/out."""
    # TODO(synk): dilation != 1 and groups != 1 (module defaults are 1) are not
    # implemented; BatchNorm uses eval-mode running stats folded into the GEMM.
    w_t, bias = params
    n = x_nchw.shape[0]
    # Activations streamed as bf16 (MXU-native, halves HBM activation bytes).
    a_t, ho, wo = im2col_T(x_nchw.astype(jnp.bfloat16),
                           kernel_size, kernel_size, stride, padding)
    y = fused_gemm_bias_relu(w_t, a_t, bias)       # [Cout, n*ho*wo] f32
    y = y.reshape(y.shape[0], n, ho, wo)           # channel-major
    return jnp.transpose(y, (1, 0, 2, 3))          # -> NCHW


# --------------------------- parameter creation -----------------------------

def make_basic_conv_params(key, in_planes, out_planes, kernel_size):
    """Conv weight (bias=False) + BatchNorm2d(eval) params, BN folded in.

    The BN scale is folded into the weights (w' = w * scale) so the kernel
    epilogue is just max(acc + bias, 0).  Weights are stored transposed as
    [Cout, kh*kw*Cin] bf16 with the K axis ordered (dy, dx, cin) to match
    im2col_T.  Returns ((w_t_bf16, bias_f32), (w_hwio_f32, scale, bias)).
    """
    kw_, kg, kb, km, kv = jax.random.split(key, 5)
    fan_in = in_planes * kernel_size * kernel_size
    w = jax.random.normal(
        kw_, (kernel_size, kernel_size, in_planes, out_planes), jnp.float32)
    w = w / jnp.sqrt(jnp.float32(fan_in))

    gamma = 1.0 + 0.1 * jax.random.normal(kg, (out_planes,), jnp.float32)
    beta = 0.1 * jax.random.normal(kb, (out_planes,), jnp.float32)
    run_mean = 0.1 * jax.random.normal(km, (out_planes,), jnp.float32)
    run_var = jnp.abs(1.0 + 0.1 * jax.random.normal(kv, (out_planes,), jnp.float32))
    eps = 1e-5
    scale = gamma / jnp.sqrt(run_var + eps)
    bias = beta - run_mean * scale

    w_scaled = w * scale                                     # fold BN scale
    w_t = w_scaled.reshape(
        kernel_size * kernel_size * in_planes, out_planes).T.astype(jnp.bfloat16)
    return (w_t, bias), (w, scale, bias)


# --------------------------------- main --------------------------------------

if __name__ == "__main__":
    root = jax.random.PRNGKey(0)
    kp, kx = jax.random.split(root)

    in_planes, out_planes, ksize, stride, padding = 16, 32, 3, 1, 1
    params, (w_hwio, scale, bias) = make_basic_conv_params(
        kp, in_planes, out_planes, ksize)
    x = jax.random.normal(kx, (2, in_planes, 16, 16), jnp.float32)

    fwd = jax.jit(functools.partial(
        basic_conv_forward, kernel_size=ksize, stride=stride, padding=padding))
    out = jax.block_until_ready(fwd(params, x))

    assert out.shape == (2, out_planes, 16, 16), out.shape
    assert out.dtype == jnp.float32
    assert bool(jnp.all(jnp.isfinite(out)))

    # Correctness check vs. a plain-JAX reference using identically bf16-rounded
    # operands (scale already folded into the weights) and f32 accumulation.
    x_bf = x.astype(jnp.bfloat16).astype(jnp.float32)
    w_bf = (w_hwio * scale).astype(jnp.bfloat16).astype(jnp.float32)
    ref = jax.lax.conv_general_dilated(
        jnp.transpose(x_bf, (0, 2, 3, 1)), w_bf,
        window_strides=(stride, stride),
        padding=[(padding, padding), (padding, padding)],
        dimension_numbers=("NHWC", "HWIO", "NHWC"),
        precision=jax.lax.Precision.HIGHEST)
    ref = jnp.maximum(ref + bias, 0.0)
    ref = jnp.transpose(ref, (0, 3, 1, 2))
    max_err = float(jnp.max(jnp.abs(out - ref)))
    assert max_err < 5e-2, max_err

    print("KERNEL_OK")
</pallas_src>

<mosaic_0001>
module attributes {stable_mosaic.version = 11 : i64} {
  func.func @_gemm_bias_relu_kernel(%arg0: i32, %arg1: i32, %arg2: i32, %arg3: memref<32x144xbf16, #tpu.memory_space<vmem>>, %arg4: memref<144x512xbf16, #tpu.memory_space<vmem>>, %arg5: memref<32x1xf32, #tpu.memory_space<vmem>>, %arg6: memref<32x512xf32, #tpu.memory_space<vmem>>) attributes {dimension_semantics = [#tpu.dimension_semantics<parallel>, #tpu.dimension_semantics<parallel>, #tpu.dimension_semantics<arbitrary>], iteration_bounds = array<i64: 1, 1, 1>, scalar_prefetch = 0 : i64, scratch_operands = 0 : i64, tpu.core_type = #tpu.core_type<tc>, window_params = [{transform_indices = @transform_0, window_bounds = array<i64: 32, 144>}, {transform_indices = @transform_1, window_bounds = array<i64: 144, 512>}, {transform_indices = @transform_2, window_bounds = array<i64: 32, 1>}, {transform_indices = @transform_3, window_bounds = array<i64: 32, 512>}]} {
    %c0 = arith.constant 0 : index
    %c0_0 = arith.constant 0 : index
    %0 = vector.load %arg3[%c0, %c0_0] : memref<32x144xbf16, #tpu.memory_space<vmem>>, vector<32x144xbf16>
    %c0_1 = arith.constant 0 : index
    %c0_2 = arith.constant 0 : index
    %1 = vector.load %arg4[%c0_1, %c0_2] : memref<144x512xbf16, #tpu.memory_space<vmem>>, vector<144x512xbf16>
    %cst = arith.constant dense<0.000000e+00> : vector<32x512xf32>
    %2 = tpu.matmul %0, %1, %cst {dimension_numbers = #tpu.dot_dimension_numbers<[1], [0], [0], [1], [0, 0, 1, 1], [], []>} : vector<32x144xbf16>, vector<144x512xbf16>, vector<32x512xf32> -> vector<32x512xf32>
    %c0_3 = arith.constant 0 : index
    %c0_4 = arith.constant 0 : index
    %3 = vector.load %arg5[%c0_3, %c0_4] : memref<32x1xf32, #tpu.memory_space<vmem>>, vector<32x1xf32>
    %4 = vector.broadcast %3 : vector<32x1xf32> to vector<32x512xf32>
    %5 = arith.addf %2, %4 : vector<32x512xf32>
    %cst_5 = arith.constant 0.000000e+00 : f32
    %6 = vector.broadcast %cst_5 : f32 to vector<32x512xf32>
    %7 = arith.maximumf %5, %6 : vector<32x512xf32>
    %c0_6 = arith.constant 0 : index
    %c0_7 = arith.constant 0 : index
    %8 = vector.load %arg6[%c0_6, %c0_7] : memref<32x512xf32, #tpu.memory_space<vmem>>, vector<32x512xf32>
    tpu.vector_store %arg6[%c0_6, %c0_7], %7 {strides = array<i32>} : memref<32x512xf32, #tpu.memory_space<vmem>>, vector<32x512xf32>,
    return
  }
  func.func @transform_0(%arg0: i32, %arg1: i32, %arg2: i32) -> (i32, i32) {
    %c0_i32 = arith.constant 0 : i32
    return %arg1, %arg2 : i32, i32
  }
  func.func @transform_1(%arg0: i32, %arg1: i32, %arg2: i32) -> (i32, i32) {
    %c0_i32 = arith.constant 0 : i32
    return %arg2, %arg0 : i32, i32
  }
  func.func @transform_2(%arg0: i32, %arg1: i32, %arg2: i32) -> (i32, i32) {
    %c0_i32 = arith.constant 0 : i32
    %c0_i32_0 = arith.constant 0 : i32
    return %arg1, %c0_i32 : i32, i32
  }
  func.func @transform_3(%arg0: i32, %arg1: i32, %arg2: i32) -> (i32, i32) {
    %c0_i32 = arith.constant 0 : i32
    return %arg1, %arg0 : i32, i32
  }
}

</mosaic_0001>

<bundles_post_ra>
// kernel: basic_conv_forward.1
= control target key start
LH: loop header
LB: loop body
LE: loop exit
PB: predicated region body
PF: predicated region fallthrough
CT: control target
= control target key end

     0   :  { %v533_v1 = vmov 0   ;;  %vm277_vm0 = vcmask 130048   ;;  %s738_s1 = inlined_call_operand.vmem [shape: bf16[144,512], index: 1, kind: input, shape index: {}]   ;;  %s739_s0 = inlined_call_operand.vmem [shape: bf16[32,144], index: 0, kind: input, shape index: {}]   ;;  %s740_s2 = inlined_call_operand.vmem [shape: f32[32,1], index: 2, kind: input, shape index: {}]   ;;  %s741_s3 = inlined_call_operand.vmem [shape: f32[32,512], index: 3, kind: output, shape index: {}]  }
   0x1   :  { %v473_v0 = vld [vmem:[%s738_s1 + $0x4] ss:$16 sps:$4 sm:$0xff]   ;;  %471 = vset.pattern.permute.xlu0 %v533_v1  ;;  %472 = vset.pattern.permute.xlu1 %v533_v1  ;;  %v475_v2 = vld [vmem:[%s738_s1 + $0xc] ss:$16 sps:$4 sm:$0xff]   ;;  %v477_v3 = vld [vmem:[%s738_s1] ss:$16 sps:$4 sm:$0xff]  }
   0x2   :  { %284 = vmatprep.subr.bf16.mxu0 %v473_v0  ;;  %v478_v4 = vld [vmem:[%s738_s1 + $0x8] ss:$16 sps:$4 sm:$0xff]   ;;  %337 = vmatprep.subr.bf16.mxu1 %v475_v2  ;;  %v479_v5 = vld [vmem:[%s738_s1 + $0x24] ss:$16 sps:$4 sm:$0xff]   ;;  %v481_v6 = vld [vmem:[%s738_s1 + $0x2c] ss:$16 sps:$4 sm:$0xff]  }
   0x3   :  { %285 = vmatpush1.bf16.msra.mxu0 %v477_v3  ;;  %338 = vmatpush1.bf16.msra.mxu1 %v478_v4  ;;  %v483_v7 = vld [vmem:[%s738_s1 + $0x20] ss:$16 sps:$4 sm:$0xff]   ;;  %v484_v8 = vld [vmem:[%s738_s1 + $0x28] ss:$16 sps:$4 sm:$0xff]   ;;  %v485_v9 = vld [vmem:[%s738_s1 + $0x44] ss:$16 sps:$4 sm:$0xff]  }
   0x4   :  { %286 = vmatprep.subr.bf16.mxu0 %v479_v5  ;;  %339 = vmatprep.subr.bf16.mxu1 %v481_v6  ;;  %v487_v10 = vld [vmem:[%s738_s1 + $0x4c] ss:$16 sps:$4 sm:$0xff]   ;;  %v489_v11 = vld [vmem:[%s738_s1 + $0x40] ss:$16 sps:$4 sm:$0xff]   ;;  %v490_v12 = vld [vmem:[%s738_s1 + $0x48] ss:$16 sps:$4 sm:$0xff]  }
   0x5   :  { %v491_v13 = vld [vmem:[%s738_s1 + $0x64] ss:$16 sps:$4 sm:$0xff]   ;;  %v493_v14 = vld [vmem:[%s738_s1 + $0x6c] ss:$16 sps:$4 sm:$0xff]   ;;  %v495_v15 = vld [vmem:[%s738_s1 + $0x60] ss:$16 sps:$4 sm:$0xff]  }
   0x6   :  { %v496_v16 = vld [vmem:[%s738_s1 + $0x68] ss:$16 sps:$4 sm:$0xff]   ;;  %v497_v17 = vld [vmem:[%s738_s1 + $0x84] ss:$16 sps:$4 sm:$0xff]   ;;  %v499_v18 = vld [vmem:[%s738_s1 + $0x8c] ss:$16 sps:$4 sm:$0xff]  }
   0x7   :  { %287 = vmatpush1.bf16.msra.mxu0 %v483_v7  ;;  %340 = vmatpush1.bf16.msra.mxu1 %v484_v8  ;;  %v501_v19 = vld [vmem:[%s738_s1 + $0x80] ss:$16 sps:$4 sm:$0xff]   ;;  %v502_v20 = vld [vmem:[%s738_s1 + $0x88] ss:$16 sps:$4 sm:$0xff]   ;;  %v503_v21 = vld [vmem:[%s738_s1 + $0xa4] ss:$16 sps:$4 sm:$0xff]  }
   0x8   :  { %288 = vmatprep.subr.bf16.mxu0 %v485_v9  ;;  %341 = vmatprep.subr.bf16.mxu1 %v487_v10  ;;  %v505_v22 = vld [vmem:[%s738_s1 + $0xac] ss:$16 sps:$4 sm:$0xff]   ;;  %v507_v23 = vld [vmem:[%s738_s1 + $0xa0] ss:$16 sps:$4 sm:$0xff]   ;;  %v508_v24 = vld [vmem:[%s738_s1 + $0xa8] ss:$16 sps:$4 sm:$0xff]  }
   0x9   :  { %v509_v25 = vld [vmem:[%s738_s1 + $0xc4] ss:$16 sps:$4 sm:$0xff]   ;;  %v511_v26 = vld [vmem:[%s738_s1 + $0xcc] ss:$16 sps:$4 sm:$0xff]   ;;  %v513_v27 = vld [vmem:[%s738_s1 + $0xc0] ss:$16 sps:$4 sm:$0xff]  }
   0xa   :  { %v514_v28 = vld [vmem:[%s738_s1 + $0xc8] ss:$16 sps:$4 sm:$0xff]   ;;  %v515_v29 = vld [vmem:[%s738_s1 + $0xe4] ss:$16 sps:$4 sm:$0xff]   ;;  %v517_v30 = vld [vmem:[%s738_s1 + $0xec] ss:$16 sps:$4 sm:$0xff]  }
   0xb   :  { %289 = vmatpush1.bf16.msra.mxu0 %v489_v11  ;;  %342 = vmatpush1.bf16.msra.mxu1 %v490_v12  ;;  %v529_v31 = vld [vmem:[%s739_s0 + $0x4] ss:$8 sps:$4 sm:$0xff]   ;;  %v57_v33 = vld [vmem:[%s740_s2 + $0x10] sm:$0xff]  ;;  %v520_v35 = vld [vmem:[%s738_s1 + $0xe8] ss:$16 sps:$4 sm:$0xff]  }
   0xc   :  { %290 = vmatprep.subr.bf16.mxu0 %v491_v13  ;;  %343 = vmatprep.subr.bf16.mxu1 %v493_v14  ;;  %v55_v32 = vld [vmem:[%s740_s2] sm:$0xff]  ;;  %v523_v37 = vld [vmem:[%s738_s1 + $0x10c] ss:$16 sps:$4 sm:$0xff]   ;;  %v526_v41 = vld [vmem:[%s738_s1 + $0x108] ss:$16 sps:$4 sm:$0xff]  }
   0xd   :  { %466 = vmatprep.mubr.msk.bf16.mxu0 %vm277_vm0, %v529_v31  ;;  %468 = vmatprep.mubr.msk.bf16.mxu1 %vm277_vm0, %v529_v31  ;;  %v519_v34 = vld [vmem:[%s738_s1 + $0xe0] ss:$16 sps:$4 sm:$0xff]   ;;  %v521_v36 = vld [vmem:[%s738_s1 + $0x104] ss:$16 sps:$4 sm:$0xff]   ;;  %v56_v38 = vld [vmem:[%s740_s2 + $0x8] sm:$0xff] }
   0xe   :  { %61 = vperm.xlu0 %471, %v55_v32   ;;  %71 = vperm.xlu1 %472, %v57_v33   ;;  %v58_v39 = vld [vmem:[%s740_s2 + $0x18] sm:$0xff]  ;;  %v525_v40 = vld [vmem:[%s738_s1 + $0x100] ss:$16 sps:$4 sm:$0xff]  }
   0xf   :  { %291 = vmatpush1.bf16.msra.mxu0 %v495_v15  ;;  %344 = vmatpush1.bf16.msra.mxu1 %v496_v16  ;;  %v527_v42 = vld [vmem:[%s739_s0] ss:$8 sps:$4 sm:$0xff]   ;;  %v530_v43 = vld [vmem:[%s739_s0 + $0x14] ss:$8 sps:$4 sm:$0xff]   ;;  %v532_v44 = vld [vmem:[%s739_s0 + $0x10] ss:$8 sps:$4 sm:$0xff]  }
  0x10   :  { %292 = vmatprep.subr.bf16.mxu0 %v497_v17  ;;  %345 = vmatprep.subr.bf16.mxu1 %v499_v18 }
  0x12   :  { %66 = vperm.xlu0 %471, %v56_v38   ;;  %76 = vperm.xlu1 %472, %v58_v39  }
  0x13   :  { %293 = vmatpush1.bf16.msra.mxu0 %v501_v19  ;;  %346 = vmatpush1.bf16.msra.mxu1 %v502_v20 }
  0x14   :  { %294 = vmatprep.subr.bf16.mxu0 %v503_v21  ;;  %347 = vmatprep.subr.bf16.mxu1 %v505_v22 }
  0x17   :  { %295 = vmatpush1.bf16.msra.mxu0 %v507_v23  ;;  %348 = vmatpush1.bf16.msra.mxu1 %v508_v24 }
  0x18   :  { %296 = vmatprep.subr.bf16.mxu0 %v509_v25  ;;  %349 = vmatprep.subr.bf16.mxu1 %v511_v26 }
  0x1b   :  { %297 = vmatpush1.bf16.msra.mxu0 %v513_v27  ;;  %350 = vmatpush1.bf16.msra.mxu1 %v514_v28 }
  0x1c   :  { %298 = vmatprep.subr.bf16.mxu0 %v515_v29  ;;  %351 = vmatprep.subr.bf16.mxu1 %v517_v30 }
  0x1f   :  { %299 = vmatpush1.bf16.msra.mxu0 %v519_v34  ;;  %352 = vmatpush1.bf16.msra.mxu1 %v520_v35 }
  0x20   :  { %300 = vmatprep.subr.bf16.mxu0 %v521_v36  ;;  %353 = vmatprep.subr.bf16.mxu1 %v523_v37 }
  0x23   :  { %301 = vmatpush1.bf16.msra.mxu0 %v525_v40  ;;  %354 = vmatpush1.bf16.msra.mxu1 %v526_v41 }
  0x26   :  { %317 = vmatmul.mubr.bf16.vlgmr.msra.gmra.mrb[0].mxu0 %v527_v42  ;;  %370 = vmatmul.mubr.bf16.vlgmr.msra.gmra.mrb[0].mxu1 %v527_v42 }
  0x27   :  { %467 = vmatprep.mubr.msk.bf16.mxu0 %vm277_vm0, %v530_v43  ;;  %469 = vmatprep.mubr.msk.bf16.mxu1 %vm277_vm0, %v530_v43 }
  0x2e   :  { %327 = vmatmul.mubr.bf16.gmra.mrb[4].mxu0 %v532_v44  ;;  %380 = vmatmul.mubr.bf16.gmra.mrb[4].mxu1 %v532_v44 }
  0x8d   :  { %v62_v45 = vpop.permute.xlu0 %61  ;;  %v72_v47 = vpop.permute.xlu1 %71 }
  0x91   :  { %v67_v46 = vpop.permute.xlu0 %66  ;;  %v77_v8 = vpop.permute.xlu1 %76 }
  0xf9   :  { %v318_v48 = vpop.f32.mrb[0].mxu0  ;;  %v371_v49 = vpop.f32.mrb[0].mxu1 }
  0xfa   :  { %v319_v50 = vadd.f32 %v318_v48, %v62_v45  ;;  %v372_v51 = vadd.f32 %v371_v49, %v62_v45  ;;  %v320_v52 = vpop.f32.mrb[1].mxu0  ;;  %v373_v53 = vpop.f32.mrb[1].mxu1 }
  0xfb   :  { %v321_v54 = vadd.f32 %v320_v52, %v62_v45  ;;  %v374_v55 = vadd.f32 %v373_v53, %v62_v45  ;;  %v322_v56 = vpop.f32.mrb[2].mxu0  ;;  %v375_v57 = vpop.f32.mrb[2].mxu1 }
  0xfc   :  { %v390_v58 = vmax.f32 %v319_v50, 0.0  ;;  %v392_v59 = vmax.f32 %v372_v51, 0.0  ;;  %v323_v60 = vadd.f32 %v322_v56, %v67_v46  ;;  %v376_v61 = vadd.f32 %v375_v57, %v67_v46  ;;  %v324_v62 = vpop.f32.mrb[3].mxu0  ;;  %v377_v63 = vpop.f32.mrb[3].mxu1 }
  0xfd   :  { %v391_v0 = vmax.f32 %v321_v54, 0.0  ;;  %v393_v1 = vmax.f32 %v374_v55, 0.0  ;;  %v325_v2 = vadd.f32 %v324_v62, %v67_v46  ;;  %v378_v3 = vadd.f32 %v377_v63, %v67_v46 }
  0xfe   :  { %406 = vst [vmem:[%s741_s3] sm:$0xff] %v390_v58  ;;  %408 = vst [vmem:[%s741_s3 + $0x10] sm:$0xff] %v392_v59  ;;  %v394_v4 = vmax.f32 %v323_v60, 0.0  ;;  %v396_v5 = vmax.f32 %v376_v61, 0.0 }
  0xff   :  { %407 = vst [vmem:[%s741_s3 + $0x8] sm:$0xff] %v391_v0  ;;  %409 = vst [vmem:[%s741_s3 + $0x18] sm:$0xff] %v393_v1  ;;  %v395_v6 = vmax.f32 %v325_v2, 0.0  ;;  %v397_v7 = vmax.f32 %v378_v3, 0.0 }
 0x100   :  { %410 = vst [vmem:[%s741_s3 + $0x20] sm:$0xff] %v394_v4  ;;  %412 = vst [vmem:[%s741_s3 + $0x30] sm:$0xff] %v396_v5 }
 0x101   :  { %411 = vst [vmem:[%s741_s3 + $0x28] sm:$0xff] %v395_v6  ;;  %413 = vst [vmem:[%s741_s3 + $0x38] sm:$0xff] %v397_v7  ;;  %v328_v9 = vpop.f32.mrb[4].mxu0  ;;  %v381_v10 = vpop.f32.mrb[4].mxu1 }
 0x102   :  { %v329_v11 = vadd.f32 %v328_v9, %v72_v47  ;;  %v382_v12 = vadd.f32 %v381_v10, %v72_v47  ;;  %v330_v13 = vpop.f32.mrb[5].mxu0  ;;  %v383_v14 = vpop.f32.mrb[5].mxu1 }
 0x103   :  { %v331_v15 = vadd.f32 %v330_v13, %v72_v47  ;;  %v384_v16 = vadd.f32 %v383_v14, %v72_v47  ;;  %v332_v17 = vpop.f32.mrb[6].mxu0  ;;  %v385_v18 = vpop.f32.mrb[6].mxu1 }
 0x104   :  { %v398_v19 = vmax.f32 %v329_v11, 0.0  ;;  %v400_v20 = vmax.f32 %v382_v12, 0.0  ;;  %v333_v21 = vadd.f32 %v332_v17, %v77_v8  ;;  %v386_v22 = vadd.f32 %v385_v18, %v77_v8  ;;  %v334_v23 = vpop.f32.mrb[7].mxu0  ;;  %v387_v24 = vpop.f32.mrb[7].mxu1 }
 0x105   :  { %v399_v25 = vmax.f32 %v331_v15, 0.0  ;;  %v401_v26 = vmax.f32 %v384_v16, 0.0  ;;  %v335_v27 = vadd.f32 %v334_v23, %v77_v8  ;;  %v388_v28 = vadd.f32 %v387_v24, %v77_v8 }
 0x106   :  { %414 = vst [vmem:[%s741_s3 + $0x40] sm:$0xff] %v398_v19  ;;  %416 = vst [vmem:[%s741_s3 + $0x50] sm:$0xff] %v400_v20  ;;  %v402_v29 = vmax.f32 %v333_v21, 0.0  ;;  %v404_v30 = vmax.f32 %v386_v22, 0.0 }
 0x107   :  { %415 = vst [vmem:[%s741_s3 + $0x48] sm:$0xff] %v399_v25  ;;  %417 = vst [vmem:[%s741_s3 + $0x58] sm:$0xff] %v401_v26  ;;  %v403_v31 = vmax.f32 %v335_v27, 0.0  ;;  %v405_v32 = vmax.f32 %v388_v28, 0.0 }
 0x108   :  { %418 = vst [vmem:[%s741_s3 + $0x60] sm:$0xff] %v402_v29  ;;  %420 = vst [vmem:[%s741_s3 + $0x70] sm:$0xff] %v404_v30 }
 0x109   :  { %419 = vst [vmem:[%s741_s3 + $0x68] sm:$0xff] %v403_v31  ;;  %421 = vst [vmem:[%s741_s3 + $0x78] sm:$0xff] %v405_v32 }

</bundles_post_ra>
